<compile_context>
chip_gen: v7x
topology: tpu7x:2x2x1
jax: 0.10.0
libtpu: 0.0.40
codegen_flags: <defaults>
</compile_context>

<pallas_src>
import numpy as np
import jax
import jax.numpy as jnp
from jax.experimental import pallas as pl
from jax.experimental.pallas import tpu as pltpu


def _communication_pallas(x_flat, M, ego, threshold, smooth):
    """x_flat: (N, C, HW) f32, M: (HW, HW) f32 (or None if not smooth), ego: (N, 1) f32.

    Returns:
      mask      (N, HW) f32 -- thresholded mask with ego rows already forced to 1.
      row_sums  (N, 1)  f32 -- per-CAV mask sums taken BEFORE ego forcing.
    """
    N, C, HW = x_flat.shape

    def kernel(*refs):
        if smooth:
            x_ref, m_ref, ego_ref, mask_ref, sums_ref = refs
        else:
            x_ref, ego_ref, mask_ref, sums_ref = refs

        x = x_ref[...]                                   # (N, C, HW)
        # sigmoid is monotone -> sigmoid(max) == max(sigmoid); 1 sigmoid instead of C.
        conf = jax.nn.sigmoid(jnp.max(x, axis=1))        # (N, HW), lane-dense
        if smooth:
            # Separable Gaussian "same" conv expressed as one lane-dense MXU matmul.
            conf = jnp.dot(conf, m_ref[...],
                           preferred_element_type=jnp.float32)
        if threshold:
            mask = jnp.where(conf > jnp.float32(threshold), 1.0, 0.0)
        else:
            mask = jnp.ones_like(conf)
        # Rate numerator is computed BEFORE the ego row is forced (matches reference).
        sums_ref[...] = jnp.sum(mask, axis=1, keepdims=True)
        mask_ref[...] = jnp.maximum(mask, ego_ref[...])  # ego CAV always transmits

    in_arrays = [x_flat] + ([M] if smooth else []) + [ego]
    in_specs = [pl.BlockSpec((N, C, HW), lambda i: (0, 0, 0))]
    if smooth:
        in_specs.append(pl.BlockSpec((HW, HW), lambda i: (0, 0)))
    in_specs.append(pl.BlockSpec((N, 1), lambda i: (0, 0)))

    return pl.pallas_call(
        kernel,
        grid=(1,),
        in_specs=in_specs,
        out_specs=(pl.BlockSpec((N, HW), lambda i: (0, 0)),
                   pl.BlockSpec((N, 1), lambda i: (0, 0))),
        out_shape=(jax.ShapeDtypeStruct((N, HW), jnp.float32),
                   jax.ShapeDtypeStruct((N, 1), jnp.float32)),
        compiler_params=pltpu.CompilerParams(
            dimension_semantics=("arbitrary",)),
    )(*in_arrays)


class Communication:
    """JAX/Pallas port of opencood Where2comm Communication (eval path)."""

    def __init__(self, args):
        self.threshold = args["threshold"]
        if "gaussian_smooth" in args:
            self.smooth = True
            self.k_size = args["gaussian_smooth"]["k_size"]
            self.sigma = args["gaussian_smooth"]["c_sigma"]
            center = self.k_size // 2
            xg, yg = np.mgrid[-center:self.k_size - center,
                              -center:self.k_size - center]
            # Same (slightly unusual) normalization as the PyTorch module: 1/(2*pi*sigma).
            self.weight = (1.0 / (2.0 * np.pi * self.sigma) *
                           np.exp(-(np.square(xg) + np.square(yg)) /
                                  (2.0 * np.square(self.sigma)))).astype(np.float32)
        else:
            self.smooth = False
            self.k_size = 1
            self.sigma = 1.0
            self.weight = np.ones((1, 1), np.float32)
        self._m_cache = {}

    def _smooth_matrix(self, H, W):
        """(H*W, H*W) matrix so that vec(out) = vec(in) @ M == Gaussian 'same' conv."""
        key = (H, W)
        if key not in self._m_cache:
            k, sigma, c = self.k_size, self.sigma, self.k_size // 2
            g = np.exp(-np.square(np.arange(k) - c) / (2.0 * np.square(sigma)))
            scale = 1.0 / (2.0 * np.pi * sigma)

            def band(n, coeffs):
                mat = np.zeros((n, n), np.float64)
                for d in range(k):
                    off = d - c
                    idx = np.arange(max(0, -off), min(n, n - off))
                    mat[idx, idx + off] = coeffs[d]
                return mat

            A = band(H, scale * g)   # smoothing along H (zero padded)
            Bm = band(W, g)          # smoothing along W (zero padded)
            # contribution of in[p,q] to out[i,j] is A[p,i] * Bm[q,j]  =>  kron.
            # TODO(synk): for large feature maps (H*W >> a few thousand) the dense kron
            #             blows up O((H*W)^2); switch to two banded matmuls with an
            #             H-tiled grid there.
            self._m_cache[key] = jnp.asarray(np.kron(A, Bm), jnp.float32)
        return self._m_cache[key]

    def forward(self, batch_confidence_maps, B):
        # TODO(synk): training-time random top-K scatter mask (random K + topk+scatter)
        #             has no clean static-shape Pallas equivalent; eval path only.
        _, C, H, W = batch_confidence_maps[0].shape
        Ls = [int(m.shape[0]) for m in batch_confidence_maps[:B]]
        N = sum(Ls)
        starts = np.cumsum([0] + Ls[:-1]).astype(np.int32)

        x = jnp.concatenate(batch_confidence_maps[:B], axis=0)
        x_flat = x.reshape(N, C, H * W).astype(jnp.float32)

        ego = np.zeros((N, 1), np.float32)
        ego[starts, 0] = 1.0

        M = self._smooth_matrix(H, W) if self.smooth else None
        mask_flat, row_sums = _communication_pallas(
            x_flat, M, jnp.asarray(ego), self.threshold, self.smooth)

        # Per-batch-element rates (segment sums / (L*H*W)), averaged over B.
        seg = np.zeros((B, N), np.float32)
        for b, s in enumerate(starts):
            seg[b, s:s + Ls[b]] = 1.0
        denom = np.array([Ls[b] * H * W for b in range(B)], np.float32)
        rates = jnp.asarray(seg) @ row_sums[:, 0] / jnp.asarray(denom)
        communication_rate = jnp.sum(rates) / B

        communication_masks = mask_flat.reshape(N, 1, H, W)
        return communication_masks, communication_rate

    __call__ = forward


def _reference(batch_confidence_maps, B, comm):
    """Pure-JAX reference mirroring the PyTorch eval path (conv-based smoothing)."""
    _, _, H, W = batch_confidence_maps[0].shape
    w = jnp.asarray(comm.weight)[None, None]            # (1,1,k,k)
    c = comm.k_size // 2
    masks, rates = [], []
    for b in range(B):
        x = batch_confidence_maps[b]
        conf = jnp.max(jax.nn.sigmoid(x), axis=1, keepdims=True)   # (L,1,H,W)
        if comm.smooth:
            conf = jax.lax.conv_general_dilated(
                conf, w, window_strides=(1, 1), padding=[(c, c), (c, c)],
                dimension_numbers=("NCHW", "OIHW", "NCHW"),
                precision=jax.lax.Precision.HIGHEST)
        L = x.shape[0]
        if comm.threshold:
            mask = jnp.where(conf > comm.threshold, 1.0, 0.0)
        else:
            mask = jnp.ones_like(conf)
        rates.append(jnp.sum(mask) / (L * H * W))
        mask = mask.at[0].set(1.0)
        masks.append(mask)
    return jnp.concatenate(masks, axis=0), sum(rates) / B


if __name__ == "__main__":
    key = jax.random.PRNGKey(0)
    args = {"threshold": 0.6,
            "gaussian_smooth": {"k_size": 5, "c_sigma": 1.0}}
    comm = Communication(args)

    B = 2
    C, H, W = 4, 16, 16
    Ls = [2, 3]
    keys = jax.random.split(key, B)
    batch_confidence_maps = [
        jax.random.normal(keys[b], (Ls[b], C, H, W), dtype=jnp.float32)
        for b in range(B)
    ]

    masks, rate = comm(batch_confidence_maps, B)
    masks, rate = jax.block_until_ready((masks, rate))

    ref_masks, ref_rate = _reference(batch_confidence_maps, B, comm)
    ref_masks, ref_rate = jax.block_until_ready((ref_masks, ref_rate))

    assert masks.shape == (sum(Ls), 1, H, W) and masks.dtype == jnp.float32
    assert float(jnp.min(masks)) >= 0.0 and float(jnp.max(masks)) <= 1.0
    assert bool(jnp.all(masks[0] == 1.0)) and bool(jnp.all(masks[Ls[0]] == 1.0))
    assert 0.0 <= float(rate) <= 1.0
    # Tolerant comparison: thresholding is a hard cutoff, so allow a few boundary
    # pixels to differ between the MXU matmul and the XLA convolution.
    assert float(jnp.mean(jnp.abs(masks - ref_masks))) < 0.02
    assert abs(float(rate) - float(ref_rate)) < 0.02
    print("KERNEL_OK")
</pallas_src>

<mosaic_0001>
module attributes {stable_mosaic.version = 11 : i64} {
  func.func @kernel(%arg0: i32, %arg1: memref<5x4x256xf32, #tpu.memory_space<vmem>>, %arg2: memref<256x256xf32, #tpu.memory_space<vmem>>, %arg3: memref<5x1xf32, #tpu.memory_space<vmem>>, %arg4: memref<5x256xf32, #tpu.memory_space<vmem>>, %arg5: memref<5x1xf32, #tpu.memory_space<vmem>>) attributes {dimension_semantics = [#tpu.dimension_semantics<arbitrary>], iteration_bounds = array<i64: 1>, scalar_prefetch = 0 : i64, scratch_operands = 0 : i64, tpu.core_type = #tpu.core_type<tc>, window_params = [{pipeline_mode = #tpu.pipeline_mode<synchronous>, transform_indices = @transform_0, window_bounds = array<i64: 5, 4, 256>}, {pipeline_mode = #tpu.pipeline_mode<synchronous>, transform_indices = @transform_1, window_bounds = array<i64: 256, 256>}, {pipeline_mode = #tpu.pipeline_mode<synchronous>, transform_indices = @transform_2, window_bounds = array<i64: 5, 1>}, {pipeline_mode = #tpu.pipeline_mode<synchronous>, transform_indices = @transform_3, window_bounds = array<i64: 5, 256>}, {pipeline_mode = #tpu.pipeline_mode<synchronous>, transform_indices = @transform_4, window_bounds = array<i64: 5, 1>}]} {
    %c0 = arith.constant 0 : index
    %c0_0 = arith.constant 0 : index
    %c0_1 = arith.constant 0 : index
    %0 = vector.load %arg1[%c0, %c0_0, %c0_1] : memref<5x4x256xf32, #tpu.memory_space<vmem>>, vector<5x4x256xf32>
    %cst = arith.constant dense<0xFF800000> : vector<5x256xf32>
    %1 = vector.multi_reduction <maximumf>, %0, %cst [1] : vector<5x4x256xf32> to vector<5x256xf32>
    %2 = arith.negf %1 : vector<5x256xf32>
    %3 = math.exp %2 : vector<5x256xf32>
    %cst_2 = arith.constant 1.000000e+00 : f32
    %4 = vector.broadcast %cst_2 : f32 to vector<5x256xf32>
    %5 = arith.addf %4, %3 : vector<5x256xf32>
    %6 = arith.divf %4, %5 : vector<5x256xf32>
    %c0_3 = arith.constant 0 : index
    %c0_4 = arith.constant 0 : index
    %7 = vector.load %arg2[%c0_3, %c0_4] : memref<256x256xf32, #tpu.memory_space<vmem>>, vector<256x256xf32>
    %cst_5 = arith.constant dense<0.000000e+00> : vector<5x256xf32>
    %8 = tpu.matmul %6, %7, %cst_5 {dimension_numbers = #tpu.dot_dimension_numbers<[1], [0], [0], [1], [0, 0, 1, 1], [], []>} : vector<5x256xf32>, vector<256x256xf32>, vector<5x256xf32> -> vector<5x256xf32>
    %cst_6 = arith.constant 6.000000e-01 : f32
    %9 = vector.broadcast %cst_6 : f32 to vector<5x256xf32>
    %10 = arith.cmpf ogt, %8, %9 : vector<5x256xf32>
    %cst_7 = arith.constant 1.000000e+00 : f32
    %cst_8 = arith.constant 0.000000e+00 : f32
    %11 = vector.broadcast %cst_7 : f32 to vector<5x256xf32>
    %12 = vector.broadcast %cst_8 : f32 to vector<5x256xf32>
    %13 = arith.select %10, %11, %12 : vector<5x256xi1>, vector<5x256xf32>
    %cst_9 = arith.constant dense<0.000000e+00> : vector<5xf32>
    %14 = vector.multi_reduction <add>, %13, %cst_9 [1] : vector<5x256xf32> to vector<5xf32>
    %15 = vector.shape_cast %14 : vector<5xf32> to vector<5x1xf32>
    %c0_10 = arith.constant 0 : index
    %c0_11 = arith.constant 0 : index
    %16 = vector.load %arg5[%c0_10, %c0_11] : memref<5x1xf32, #tpu.memory_space<vmem>>, vector<5x1xf32>
    tpu.vector_store %arg5[%c0_10, %c0_11], %15 {strides = array<i32>} : memref<5x1xf32, #tpu.memory_space<vmem>>, vector<5x1xf32>,
    %c0_12 = arith.constant 0 : index
    %c0_13 = arith.constant 0 : index
    %17 = vector.load %arg3[%c0_12, %c0_13] : memref<5x1xf32, #tpu.memory_space<vmem>>, vector<5x1xf32>
    %18 = vector.broadcast %17 : vector<5x1xf32> to vector<5x256xf32>
    %19 = arith.maximumf %13, %18 : vector<5x256xf32>
    %c0_14 = arith.constant 0 : index
    %c0_15 = arith.constant 0 : index
    %20 = vector.load %arg4[%c0_14, %c0_15] : memref<5x256xf32, #tpu.memory_space<vmem>>, vector<5x256xf32>
    tpu.vector_store %arg4[%c0_14, %c0_15], %19 {strides = array<i32>} : memref<5x256xf32, #tpu.memory_space<vmem>>, vector<5x256xf32>,
    return
  }
  func.func @transform_0(%arg0: i32) -> (i32, i32, i32) {
    %c0_i32 = arith.constant 0 : i32
    %c0_i32_0 = arith.constant 0 : i32
    %c0_i32_1 = arith.constant 0 : i32
    %c0_i32_2 = arith.constant 0 : i32
    return %c0_i32, %c0_i32_0, %c0_i32_1 : i32, i32, i32
  }
  func.func @transform_1(%arg0: i32) -> (i32, i32) {
    %c0_i32 = arith.constant 0 : i32
    %c0_i32_0 = arith.constant 0 : i32
    %c0_i32_1 = arith.constant 0 : i32
    return %c0_i32, %c0_i32_0 : i32, i32
  }
  func.func @transform_2(%arg0: i32) -> (i32, i32) {
    %c0_i32 = arith.constant 0 : i32
    %c0_i32_0 = arith.constant 0 : i32
    %c0_i32_1 = arith.constant 0 : i32
    return %c0_i32, %c0_i32_0 : i32, i32
  }
  func.func @transform_3(%arg0: i32) -> (i32, i32) {
    %c0_i32 = arith.constant 0 : i32
    %c0_i32_0 = arith.constant 0 : i32
    %c0_i32_1 = arith.constant 0 : i32
    return %c0_i32, %c0_i32_0 : i32, i32
  }
  func.func @transform_4(%arg0: i32) -> (i32, i32) {
    %c0_i32 = arith.constant 0 : i32
    %c0_i32_0 = arith.constant 0 : i32
    %c0_i32_1 = arith.constant 0 : i32
    return %c0_i32, %c0_i32_0 : i32, i32
  }
}

</mosaic_0001>

<bundles_post_ra>
// kernel: tpu_custom_call.1
= control target key start
LH: loop header
LB: loop body
LE: loop exit
PB: predicated region body
PF: predicated region fallthrough
CT: control target
= control target key end

     0   :  { %10 = vsyncpa [#allocation3], 0  ;;  %s759_s0 = inlined_call_operand.hbm [shape: f32[5,4,256], index: 0, kind: input, shape index: {}]   ;;  %s760_s1 = inlined_call_operand.hbm [shape: f32[256,256], index: 1, kind: input, shape index: {}]   ;;  %s761_s2 = inlined_call_operand.vmem [shape: f32[5,1], index: 2, kind: input, shape index: {}]   ;;  %s762_s3 = inlined_call_operand.hbm [shape: f32[5,256], index: 3, kind: output, shape index: {0}]   ;;  %s763_s4 = inlined_call_operand.vmem [shape: f32[5,1], index: 4, kind: output, shape index: {1}]  }
   0x1   :  { %11 = vsyncpa [#allocation6], 0 }
   0x2   :  { %12 = vsyncpa [#allocation4], 0  ;;  %s598_s15 = smov [#allocation2]   ;;  %s526_s19 = scalar_lea.hbm %s759_s0, 640 }
   0x3   :  { %s18_s16 = sshll.u32 %s598_s15, 4  ;;  %p527_p0 = scmp.ne.s32.totalorder %s759_s0, %s526_s19  ;;  %s19_s16 = int_to_ptr.vmem [resolvable:$true] %s18_s16 }
   0x4   :  { %p530_p1 = scmp.lt.u32.totalorder %s526_s19, %s759_s0 }
   0x6   :  { %p532_p2 = pnand %p530_p1, %p527_p0 }
   0x8   :  { %535 = shalt.err (!%p532_p2)
}
   0x9   :  { %s536_s24 = scalar_lea.vmem %s19_s16, 640  ;;  %p541_p4 = scmp.lt.s32.totalorder %s19_s16, %s19_s16 }
   0xa   :  { %p537_p3 = scmp.ne.s32.totalorder %s19_s16, %s536_s24  ;;  %p542_p5 = scmp.lt.s32.totalorder %s536_s24, %s536_s24 }
   0xc   :  { %p543_p6 = por %p542_p5, %p541_p4 }
   0xe   :  { %p544_p7 = pnand %p543_p6, %p537_p3 }
  0x10   :  { %547 = shalt.err (!%p544_p7)
}
  0x11   :  { %s599_s25 = smov 128   ;;  %s600_s26 = smov 8  }
  0x12   :  { %24 = dma.hbm_to_vmem [thread:$0]  %s759_s0, 640, %s19_s16, [#allocation3], %s599_s25, %s599_s25, %s600_s26  }
  0x13   :  { %s601_s29 = smov [#allocation5]   ;;  %s548_s7 = scalar_lea.hbm %s760_s1, 8192 }
  0x14   :  { %s30_s30 = sshll.u32 %s601_s29, 4  ;;  %p549_p8 = scmp.ne.s32.totalorder %s760_s1, %s548_s7  ;;  %s31_s30 = int_to_ptr.vmem [resolvable:$true] %s30_s30 }
  0x15   :  { %p552_p9 = scmp.lt.u32.totalorder %s548_s7, %s760_s1 }
  0x17   :  { %p554_p10 = pnand %p552_p9, %p549_p8 }
  0x19   :  { %557 = shalt.err (!%p554_p10)
}
  0x1a   :  { %s558_s12 = scalar_lea.vmem %s31_s30, 8192  ;;  %p563_p12 = scmp.lt.s32.totalorder %s31_s30, %s31_s30 }
  0x1b   :  { %p559_p11 = scmp.ne.s32.totalorder %s31_s30, %s558_s12  ;;  %p564_p13 = scmp.lt.s32.totalorder %s558_s12, %s558_s12 }
  0x1d   :  { %p565_p0 = por %p564_p13, %p563_p12 }
  0x1f   :  { %p566_p1 = pnand %p565_p0, %p559_p11 }
  0x21   :  { %569 = shalt.err (!%p566_p1)
}
  0x22   :  { %s602_s0 = smov 256   ;;  %s603_s13 = smov 16  }
  0x23   :  { %36 = dma.hbm_to_vmem [thread:$0]  %s760_s1, 8192, %s31_s30, [#allocation6], %s602_s0, %s602_s0, %s603_s13  }
  0x24   :  { %592 = dma.done.wait [#allocation3], 640  }
  0x25   :  { %593 = vsyncadd [#allocation3], 4294966656 }
  0x26   :  { %594 = dma.done.wait [#allocation6], 8192  }
  0x27   :  { %595 = vsyncadd [#allocation6], 4294959104  ;;  %v197_v0 = vld [vmem:[#allocation5 + $0x8] sm:$0xff]  ;;  %v199_v1 = vld [vmem:[#allocation5 + $0x18] sm:$0xff]  ;;  %vm65_vm0 = vcmask 1043456   ;;  %vm270_vm1 = vcmask 1041409  }
  0x28   :  { %v196_v2 = vld [vmem:[#allocation5] sm:$0xff]  ;;  %v407_v3 = vpack.c.bf16 %v199_v1, %v197_v0  ;;  %v198_v4 = vld [vmem:[#allocation5 + $0x10] sm:$0xff]  ;;  %v201_v5 = vld [vmem:[#allocation5 + $0x28] sm:$0xff]  ;;  %vm272_vm2 = vcmask 1042434   ;;  %vm274_vm3 = vcmask 1043459   ;;  %vm276_vm4 = vcmask 1044484  }
  0x29   :  { %v203_v6 = vld [vmem:[#allocation5 + $0x38] sm:$0xff]  ;;  %v409_v7 = vpack.c.bf16 %v198_v4, %v196_v2  ;;  %v200_v9 = vld [vmem:[#allocation5 + $0x20] sm:$0xff]  ;;  %v202_v10 = vld [vmem:[#allocation5 + $0x30] sm:$0xff]  ;;  %vm359_vm5 = vcmask 1044480   ;;  %vm365_vm8 = vcmask 4096   ;;  %s606_s19 = smov [#allocation7]  }
  0x2a   :  { %v411_v8 = vpack.c.bf16 %v203_v6, %v201_v5  ;;  %v205_v11 = vld [vmem:[#allocation5 + $0x48] sm:$0xff]  ;;  %408 = vmatprep.subr.bf16.mxu0 %v407_v3  ;;  %v207_v12 = vld [vmem:[#allocation5 + $0x58] sm:$0xff]  ;;  %v413_v13 = vpack.c.bf16 %v202_v10, %v200_v9  ;;  %v204_v15 = vld [vmem:[#allocation5 + $0x40] sm:$0xff]  ;;  %s383_s20 = sshll.u32 %s606_s19, 4  ;;  %s384_s20 = int_to_ptr.vmem [resolvable:$true] %s383_s20 }
  0x2b   :  { %410 = vmatpush1.bf16.msra.mxu0 %v409_v7  ;;  %v415_v14 = vpack.c.bf16 %v207_v12, %v205_v11  ;;  %v206_v16 = vld [vmem:[#allocation5 + $0x50] sm:$0xff]  ;;  %v209_v17 = vld [vmem:[#allocation5 + $0x68] sm:$0xff]  ;;  %v211_v18 = vld [vmem:[#allocation5 + $0x78] sm:$0xff]  ;;  %s570_s21 = scalar_lea.vmem %s384_s20, 256  ;;  %p575_p3 = scmp.lt.s32.totalorder %s384_s20, %s384_s20 }
  0x2c   :  { %412 = vmatprep.subr.bf16.mxu0 %v411_v8  ;;  %v417_v19 = vpack.c.bf16 %v206_v16, %v204_v15  ;;  %v419_v20 = vpack.c.bf16 %v211_v18, %v209_v17  ;;  %v208_v21 = vld [vmem:[#allocation5 + $0x60] sm:$0xff]  ;;  %v210_v22 = vld [vmem:[#allocation5 + $0x70] sm:$0xff]  ;;  %v213_v23 = vld [vmem:[#allocation5 + $0x88] sm:$0xff]  ;;  %p571_p2 = scmp.ne.s32.totalorder %s384_s20, %s570_s21  ;;  %p576_p4 = scmp.lt.s32.totalorder %s570_s21, %s570_s21 }
  0x2d   :  { %v215_v24 = vld [vmem:[#allocation5 + $0x98] sm:$0xff]  ;;  %v421_v25 = vpack.c.bf16 %v210_v22, %v208_v21  ;;  %v212_v27 = vld [vmem:[#allocation5 + $0x80] sm:$0xff]  ;;  %v214_v28 = vld [vmem:[#allocation5 + $0x90] sm:$0xff] }
  0x2e   :  { %v423_v26 = vpack.c.bf16 %v215_v24, %v213_v23  ;;  %v217_v29 = vld [vmem:[#allocation5 + $0xa8] sm:$0xff]  ;;  %v219_v30 = vld [vmem:[#allocation5 + $0xb8] sm:$0xff]  ;;  %v216_v31 = vld [vmem:[#allocation5 + $0xa0] sm:$0xff]  ;;  %v425_v40 = vpack.c.bf16 %v214_v28, %v212_v27  ;;  %p577_p5 = por %p576_p4, %p575_p3 }
  0x2f   :  { %414 = vmatpush1.bf16.msra.mxu0 %v413_v13  ;;  %v218_v32 = vld [vmem:[#allocation5 + $0xb0] sm:$0xff]  ;;  %v221_v33 = vld [vmem:[#allocation5 + $0xc8] sm:$0xff]  ;;  %v223_v34 = vld [vmem:[#allocation5 + $0xd8] sm:$0xff]  ;;  %v427_v44 = vpack.c.bf16 %v219_v30, %v217_v29 }
  0x30   :  { %416 = vmatprep.subr.bf16.mxu0 %v415_v14  ;;  %v656_v35 = vld [vmem:[#allocation5 + $0xc0] sm:$0xff]  ;;  %v222_v36 = vld [vmem:[#allocation5 + $0xd0] sm:$0xff]  ;;  %v658_v37 = vld [vmem:[#allocation5 + $0xe8] sm:$0xff]  ;;  %v429_v51 = vpack.c.bf16 %v218_v32, %v216_v31  ;;  %v431_v54 = vpack.c.bf16 %v223_v34, %v221_v33  ;;  %p578_p6 = pnand %p577_p5, %p571_p2 }
  0x31   :  { %v660_v38 = vld [vmem:[#allocation5 + $0xf8] sm:$0xff]  ;;  %v662_v39 = vld [vmem:[#allocation5 + $0xe0] sm:$0xff]  ;;  %v664_v41 = vld [vmem:[#allocation5 + $0xf0] sm:$0xff]  ;;  %v433_v55 = vpack.c.bf16 %v222_v36, %v656_v35 }
  0x32   :  { %v666_v42 = vld [vmem:[#allocation5 + $0x108] sm:$0xff]  ;;  %v668_v43 = vld [vmem:[#allocation5 + $0x118] sm:$0xff]  ;;  %v670_v45 = vld [vmem:[#allocation5 + $0x100] sm:$0xff]  ;;  %v435_v56 = vpack.c.bf16 %v660_v38, %v658_v37  ;;  %v437_v57 = vpack.c.bf16 %v664_v41, %v662_v39 }
  0x33   :  { %418 = vmatpush1.bf16.msra.mxu0 %v417_v19  ;;  %v672_v46 = vld [vmem:[#allocation5 + $0x110] sm:$0xff]  ;;  %v674_v47 = vld [vmem:[#allocation5 + $0x128] sm:$0xff]  ;;  %v676_v48 = vld [vmem:[#allocation5 + $0x138] sm:$0xff]  ;;  %v439_v58 = vpack.c.bf16 %v668_v43, %v666_v42 }
  0x34   :  { %420 = vmatprep.subr.bf16.mxu0 %v419_v20  ;;  %v678_v49 = vld [vmem:[#allocation5 + $0x120] sm:$0xff]  ;;  %v680_v50 = vld [vmem:[#allocation5 + $0x130] sm:$0xff]  ;;  %v682_v52 = vld [vmem:[#allocation5 + $0x148] sm:$0xff]  ;;  %v441_v59 = vpack.c.bf16 %v672_v46, %v670_v45  ;;  %v443_v60 = vpack.c.bf16 %v676_v48, %v674_v47 }
  0x35   :  { %v684_v53 = vld [vmem:[#allocation5 + $0x158] sm:$0xff]  ;;  %v445_v61 = vpack.c.bf16 %v680_v50, %v678_v49  ;;  %v46_v63 = vld [vmem:[#allocation2 + $0x8] sm:$0xff]  ;;  %v47_v1 = vld [vmem:[#allocation2 + $0x10] sm:$0xff] }
  0x36   :  { %v45_v62 = vld [vmem:[#allocation2] sm:$0xff]  ;;  %v447_v0 = vpack.c.bf16 %v684_v53, %v682_v52  ;;  %v701_v2 = vld [vmem:[#allocation2 + $0x18] sm:$0xff]  ;;  %v56_v5 = vcombine.high %v46_v63, %v46_v63  ;;  %v57_v7 = vcombine.high %v47_v1, %v47_v1  ;;  %v80_v13 = vsel %vm65_vm0, %v46_v63, -inf  ;;  %v240_v47 = vld [vmem:[#allocation5 + $0x160] sm:$0xff] }
  0x37   :  { %422 = vmatpush1.bf16.msra.mxu0 %v421_v25  ;;  %v703_v3 = vld [vmem:[#allocation2 + $0x20] sm:$0xff]  ;;  %v55_v4 = vcombine.high %v45_v62, %v45_v62  ;;  %v66_v6 = vsel %vm65_vm0, %v45_v62, -inf  ;;  %v58_v8 = vcombine.high %v701_v2, %v701_v2  ;;  %v94_v14 = vsel %vm65_vm0, %v47_v1, -inf  ;;  %v242_v48 = vld [vmem:[#allocation5 + $0x170] sm:$0xff]  ;;  %v249_v53 = vld [vmem:[#allocation5 + $0x1a8] sm:$0xff] }
  0x38   :  { %424 = vmatprep.subr.bf16.mxu0 %v423_v26  ;;  %v59_v9 = vcombine.high %v703_v3, %v703_v3  ;;  %v67_v10 = vrot.slane %v66_v6, 4  ;;  %v87_v12 = vsel %vm65_vm0, %v56_v5, -inf  ;;  %v101_v17 = vsel %vm65_vm0, %v57_v7, -inf  ;;  %v236_v7 = vld [vmem:[#allocation5 + $0x140] sm:$0xff]  ;;  %v246_v52 = vld [vmem:[#allocation5 + $0x190] sm:$0xff] }
  0x39   :  { %v73_v11 = vsel %vm65_vm0, %v55_v4, -inf  ;;  %v88_v16 = vrot.slane %v87_v12, 4  ;;  %v115_v18 = vsel %vm65_vm0, %v58_v8, -inf  ;;  %v102_v19 = vrot.slane %v101_v17, 4  ;;  %v238_v8 = vld [vmem:[#allocation5 + $0x150] sm:$0xff] }
  0x3a   :  { %v74_v15 = vrot.slane %v73_v11, 4  ;;  %v116_v20 = vrot.slane %v115_v18, 4  ;;  %v129_v21 = vsel %vm65_vm0, %v59_v9, -inf  ;;  %v68_v22 = vmax.f32 %v66_v6, %v67_v10 }
  0x3b   :  { %426 = vmatpush1.bf16.msra.mxu0 %v425_v40  ;;  %v89_v24 = vmax.f32 %v87_v12, %v88_v16  ;;  %v130_v25 = vrot.slane %v129_v21, 4  ;;  %v81_v26 = vrot.slane %v80_v13, 4  ;;  %v103_v27 = vmax.f32 %v101_v17, %v102_v19 }
  0x3c   :  { %428 = vmatprep.subr.bf16.mxu0 %v427_v44  ;;  %v75_v23 = vmax.f32 %v73_v11, %v74_v15  ;;  %v117_v28 = vmax.f32 %v115_v18, %v116_v20  ;;  %v69_v29 = vrot.slane %v68_v22, 2  ;;  %v95_v30 = vrot.slane %v94_v14, 4  ;;  %v241_v15 = vld [vmem:[#allocation5 + $0x168] sm:$0xff] }
  0x3d   :  { %v90_v32 = vrot.slane %v89_v24, 2  ;;  %v131_v33 = vmax.f32 %v129_v21, %v130_v25  ;;  %v82_v34 = vmax.f32 %v80_v13, %v81_v26  ;;  %v104_v35 = vrot.slane %v103_v27, 2  ;;  %v243_v21 = vld [vmem:[#allocation5 + $0x178] sm:$0xff] }
  0x3e   :  { %v76_v31 = vrot.slane %v75_v23, 2  ;;  %v118_v36 = vrot.slane %v117_v28, 2  ;;  %v70_v37 = vmax.f32 %v68_v22, %v69_v29  ;;  %v96_v38 = vmax.f32 %v94_v14, %v95_v30  ;;  %v247_v29 = vld [vmem:[#allocation5 + $0x198] sm:$0xff] }
  0x3f   :  { %430 = vmatpush1.bf16.msra.mxu0 %v429_v51  ;;  %v91_v40 = vmax.f32 %v89_v24, %v90_v32  ;;  %v132_v41 = vrot.slane %v131_v33, 2  ;;  %v83_v42 = vrot.slane %v82_v34, 2  ;;  %v105_v43 = vmax.f32 %v103_v27, %v104_v35 }
  0x40   :  { %432 = vmatprep.subr.bf16.mxu0 %v431_v54  ;;  %v77_v39 = vmax.f32 %v75_v23, %v76_v31  ;;  %v119_v44 = vmax.f32 %v117_v28, %v118_v36  ;;  %v71_v51 = vrot.slane %v70_v37, 1  ;;  %v97_v54 = vrot.slane %v96_v38, 2  ;;  %v245_v28 = vld [vmem:[#allocation5 + $0x188] sm:$0xff] }
  0x41   :  { %v133_v62 = vmax.f32 %v131_v33, %v132_v41  ;;  %v84_v63 = vmax.f32 %v82_v34, %v83_v42  ;;  %v106_v1 = vrot.slane %v105_v43, 1  ;;  %v108_v14 = vsel %vm65_vm0, %v701_v2, -inf  ;;  %v244_v33 = vld [vmem:[#allocation5 + $0x180] sm:$0xff]  ;;  %v250_v41 = vld [vmem:[#allocation5 + $0x1b0] sm:$0xff] }
  0x42   :  { %v120_v4 = vrot.slane %v119_v44, 1  ;;  %v72_v5 = vmax.f32 %v70_v37, %v71_v51  ;;  %v98_v6 = vmax.f32 %v96_v38, %v97_v54  ;;  %v449_v20 = vpack.c.bf16 %v238_v8, %v236_v7  ;;  %v255_v51 = vld [vmem:[#allocation5 + $0x1d8] sm:$0xff]  ;;  %v252_v7 = vld [vmem:[#allocation5 + $0x1c0] sm:$0xff]  ;;  %v254_v8 = vld [vmem:[#allocation5 + $0x1d0] sm:$0xff] }
  0x43   :  { %434 = vmatpush1.bf16.msra.mxu0 %v433_v55  ;;  %v78_v55 = vrot.slane %v77_v39, 1  ;;  %v134_v11 = vrot.slane %v133_v62, 1  ;;  %v85_v12 = vrot.slane %v84_v63, 1  ;;  %v109_v46 = vrot.slane %v108_v14, 4 }
  0x44   :  { %436 = vmatprep.subr.bf16.mxu0 %v435_v56  ;;  %v92_v56 = vrot.slane %v91_v40, 1  ;;  %v99_v13 = vrot.slane %v98_v6, 1  ;;  %v122_v2 = vsel %vm65_vm0, %v703_v3, -inf  ;;  %v397_v25 = vmul.f32 -1.442695, %v72_v5 }
  0x45   :  { %v79_v9 = vmax.f32 %v77_v39, %v78_v55  ;;  %v135_v16 = vmax.f32 %v133_v62, %v134_v11  ;;  %v86_v19 = vmax.f32 %v84_v63, %v85_v12  ;;  %v123_v24 = vrot.slane %v122_v2, 4  ;;  %v257_v12 = vld [vmem:[#allocation5 + $0x1e8] sm:$0xff] }
  0x46   :  { %v93_v10 = vmax.f32 %v91_v40, %v92_v56  ;;  %v100_v23 = vmax.f32 %v98_v6, %v99_v13  ;;  %v451_v26 = vpack.c.bf16 %v243_v21, %v241_v15  ;;  %v453_v49 = vpack.c.bf16 %v242_v48, %v240_v47  ;;  %v248_v40 = vld [vmem:[#allocation5 + $0x1a0] sm:$0xff] }
  0x47   :  { %438 = vmatpush1.bf16.msra.mxu0 %v437_v57  ;;  %v107_v57 = vmax.f32 %v105_v43, %v106_v1  ;;  %v398_v17 = vmul.f32 -1.442695, %v79_v9  ;;  %v399_v27 = vmul.f32 -1.442695, %v86_v19  ;;  %v124_v30 = vmax.f32 %v122_v2, %v123_v24 }
  0x48   :  { %440 = vmatprep.subr.bf16.mxu0 %v439_v58  ;;  %v121_v58 = vmax.f32 %v119_v44, %v120_v4  ;;  %v400_v18 = vmul.f32 -1.442695, %v93_v10  ;;  %v401_v31 = vmul.f32 -1.442695, %v100_v23  ;;  %v455_v32 = vpack.c.bf16 %v247_v29, %v245_v28  ;;  %v253_v44 = vld [vmem:[#allocation5 + $0x1c8] sm:$0xff] }
  0x49   :  { %v402_v22 = vmul.f32 -1.442695, %v107_v57  ;;  %486 = vpow2.f32 %v398_v17  ;;  %v457_v36 = vpack.c.bf16 %v246_v52, %v244_v33  ;;  %v461_v1 = vpack.c.bf16 %v250_v41, %v248_v40  ;;  %v259_v57 = vld [vmem:[#allocation5 + $0x1f8] sm:$0xff]  ;;  %v256_v17 = vld [vmem:[#allocation5 + $0x1e0] sm:$0xff] }
  0x4a   :  { %v404_v45 = vmul.f32 -1.442695, %v121_v58  ;;  %488 = vpow2.f32 %v400_v18  ;;  %v463_v6 = vpack.c.bf16 %v255_v51, %v253_v44  ;;  %v465_v15 = vpack.c.bf16 %v254_v8, %v252_v7  ;;  %v258_v18 = vld [vmem:[#allocation5 + $0x1f0] sm:$0xff]  ;;  %v367_v41 = vld [vmem:[%s761_s2] sm:$0x1f] }
  0x4b   :  { %442 = vmatpush1.bf16.msra.mxu0 %v441_v59  ;;  %v406_v59 = vmul.f32 -1.442695, %v135_v16  ;;  %490 = vpow2.f32 %v402_v22  ;;  %v467_v16 = vpack.c.bf16 %v259_v57, %v257_v12  ;;  %v469_v22 = vpack.c.bf16 %v258_v18, %v256_v17 }
  0x4c   :  { %444 = vmatprep.subr.bf16.mxu0 %v443_v60  ;;  %v110_v60 = vmax.f32 %v108_v14, %v109_v46  ;;  %492 = vpow2.f32 %v404_v45 }
  0x4d   :  { %494 = vpow2.f32 %v406_v59 }
  0x4e   :  { %v111_v3 = vrot.slane %v110_v60, 2  ;;  %496 = vpow2.f32 %v397_v25 }
  0x4f   :  { %446 = vmatpush1.bf16.msra.mxu0 %v445_v61  ;;  %v125_v61 = vrot.slane %v124_v30, 2  ;;  %498 = vpow2.f32 %v399_v27 }
  0x50   :  { %448 = vmatprep.subr.bf16.mxu0 %v447_v0  ;;  %v112_v50 = vmax.f32 %v110_v60, %v111_v3  ;;  %v251_v0 = vld [vmem:[#allocation5 + $0x1b8] sm:$0xff]  ;;  %500 = vpow2.f32 %v401_v31 }
  0x51   :  { %v126_v35 = vmax.f32 %v124_v30, %v125_v61  ;;  %v459_v39 = vpack.c.bf16 %v251_v0, %v249_v53  ;;  %v604_v53 = vmov 0  }
  0x52   :  { %v113_v34 = vrot.slane %v112_v50, 1  ;;  %480 = vset.pattern.permute.xlu0 %v604_v53 }
  0x53   :  { %450 = vmatpush1.bf16.msra.mxu0 %v449_v20  ;;  %v127_v37 = vrot.slane %v126_v35, 1  ;;  %v487_v38 = vpop.eup %486 }
  0x54   :  { %452 = vmatprep.subr.bf16.mxu0 %v451_v26  ;;  %v114_v42 = vmax.f32 %v112_v50, %v113_v34  ;;  %v489_v43 = vpop.eup %488  ;;  %v167_v54 = vadd.f32 1.0, %v487_v38 }
  0x55   :  { %v128_v55 = vmax.f32 %v126_v35, %v127_v37  ;;  %v491_v56 = vpop.eup %490  ;;  %v169_v62 = vadd.f32 1.0, %v489_v43  ;;  %v605_v35 = vmov 0.0  }
  0x56   :  { %v493_v63 = vpop.eup %492  ;;  %v171_v4 = vadd.f32 1.0, %v491_v56  ;;  %502 = vrcp.f32 %v167_v54  ;;  %v403_v10 = vmul.f32 -1.442695, %v114_v42 }
  0x57   :  { %454 = vmatpush1.bf16.msra.mxu0 %v453_v49  ;;  %v495_v5 = vpop.eup %494  ;;  %v173_v9 = vadd.f32 1.0, %v493_v63  ;;  %504 = vrcp.f32 %v169_v62  ;;  %v405_v13 = vmul.f32 -1.442695, %v128_v55 }
  0x58   :  { %456 = vmatprep.subr.bf16.mxu0 %v455_v32  ;;  %v497_v11 = vpop.eup %496  ;;  %v175_v58 = vadd.f32 1.0, %v495_v5  ;;  %506 = vrcp.f32 %v171_v4 }
  0x59   :  { %v499_v14 = vpop.eup %498  ;;  %508 = vrcp.f32 %v173_v9  ;;  %v166_v19 = vadd.f32 1.0, %v497_v11 }
  0x5a   :  { %510 = vrcp.f32 %v175_v58  ;;  %v501_v20 = vpop.eup %500  ;;  %v168_v21 = vadd.f32 1.0, %v499_v14 }
  0x5b   :  { %458 = vmatpush1.bf16.msra.mxu0 %v457_v36  ;;  %512 = vpow2.f32 %v403_v10  ;;  %v170_v45 = vadd.f32 1.0, %v501_v20 }
  0x5c   :  { %460 = vmatprep.subr.bf16.mxu0 %v459_v39  ;;  %514 = vpow2.f32 %v405_v13 }
  0x5d   :  { %516 = vrcp.f32 %v166_v19 }
  0x5e   :  { %518 = vrcp.f32 %v168_v21 }
  0x5f   :  { %462 = vmatpush1.bf16.msra.mxu0 %v461_v1  ;;  %520 = vrcp.f32 %v170_v45 }
  0x60   :  { %464 = vmatprep.subr.bf16.mxu0 %v463_v6  ;;  %v503_v46 = vpop.eup %502 }
  0x61   :  { %v505_v59 = vpop.eup %504 }
  0x62   :  { %v507_v23 = vpop.eup %506  ;;  %v278_v2 = vsel %vm270_vm1, %v505_v59, %v503_v46 }
  0x63   :  { %466 = vmatpush1.bf16.msra.mxu0 %v465_v15  ;;  %v509_v47 = vpop.eup %508  ;;  %v279_v48 = vsel %vm272_vm2, %v507_v23, %v278_v2 }
  0x64   :  { %468 = vmatprep.subr.bf16.mxu0 %v467_v16  ;;  %v511_v60 = vpop.eup %510  ;;  %v280_v24 = vsel %vm274_vm3, %v509_v47, %v279_v48 }
  0x65   :  { %v513_v25 = vpop.eup %512  ;;  %v281_v26 = vsel %vm276_vm4, %v511_v60, %v280_v24 }
  0x66   :  { %v515_v27 = vpop.eup %514  ;;  %348 = vmatprep.mubr.f32.mxu0 %v281_v26  ;;  %v172_v28 = vadd.f32 1.0, %v513_v25 }
  0x67   :  { %470 = vmatpush1.bf16.msra.mxu0 %v469_v22  ;;  %v174_v29 = vadd.f32 1.0, %v515_v27  ;;  %v517_v3 = vpop.eup %516 }
  0x68   :  { %522 = vrcp.f32 %v172_v28  ;;  %v519_v30 = vpop.eup %518 }
  0x69   :  { %524 = vrcp.f32 %v174_v29  ;;  %v521_v49 = vpop.eup %520  ;;  %v271_v50 = vsel %vm270_vm1, %v519_v30, %v517_v3 }
  0x6a   :  { %v273_v61 = vsel %vm272_vm2, %v521_v49, %v271_v50 }
  0x72   :  { %v523_v31 = vpop.eup %522 }
  0x73   :  { %v525_v32 = vpop.eup %524  ;;  %v275_v33 = vsel %vm274_vm3, %v523_v31, %v273_v61 }
  0x74   :  { %v277_v52 = vsel %vm276_vm4, %v525_v32, %v275_v33 }
  0x75   :  { %349 = vmatmul.mubr.f32.vlgmr.msra.gmra.mrb[0].mxu0 %v277_v52 }
 0x148   :  { %v350_v0 = vpop.f32.mrb[0].mxu0 }
 0x149   :  { %vm355_vm6 = vcmp.gt.f32.partialorder %v350_v0, 0.6  ;;  %v352_v34 = vpop.f32.mrb[1].mxu0 }
 0x14a   :  { %v357_v36 = vsel %vm355_vm6, 1.0, %v605_v35  ;;  %vm356_vm7 = vcmp.gt.f32.partialorder %v352_v34, 0.6 }
 0x14b   :  { %v358_v37 = vsel %vm356_vm7, 1.0, %v605_v35  ;;  %v360_v38 = vsel %vm359_vm5, %v357_v36, 0.0 }
 0x14c   :  { %v361_v39 = vsel %vm359_vm5, %v358_v37, 0.0 }
 0x14d   :  { %v362_v40 = vadd.f32 %v361_v39, %v360_v38 }
 0x14f   :  { %363 = vadd.xlane.f32.xlu0 %v362_v40 }
 0x165   :  { %370 = vperm.xlu0 %480, %v367_v41  }
 0x1dc   :  { %v364_v42 = vpop.xlane.xlu0 %363 }
 0x1dd   :  { %366 = vst.msk [vmem:[%s763_s4] sm:$0x1f] %vm365_vm8, %v364_v42 }
 0x1e4   :  { %v371_v43 = vpop.permute.xlu0 %370 }
 0x1e5   :  { %v373_v44 = vmax.f32 %v357_v36, %v371_v43  ;;  %v374_v51 = vmax.f32 %v358_v37, %v371_v43 }
 0x1e7   :  { %375 = vst [vmem:[#allocation7] sm:$0x1f] %v373_v44  ;;  %376 = vst [vmem:[#allocation7 + $0x8] sm:$0x1f] %v374_v51 }
 0x1e8   :  { %581 = shalt.err (!%p578_p6)
}
 0x1e9   :  { %s582_s23 = scalar_lea.hbm %s762_s3, 256 }
 0x1ea   :  { %p583_p7 = scmp.ne.s32.totalorder %s762_s3, %s582_s23  ;;  %p586_p8 = scmp.lt.u32.totalorder %s582_s23, %s762_s3 }
 0x1ec   :  { %p588_p9 = pnand %p586_p8, %p583_p7 }
 0x1ee   :  { %591 = shalt.err (!%p588_p9)
}
 0x1ef   :  { %386 = dma.vmem_to_hbm [thread:$0]  %s384_s20, 256, %s762_s3, [#allocation4]  }
 0x1f0   :  { %596 = dma.done.wait [#allocation4], 256  }
 0x1f1   :  { %597 = vsyncadd [#allocation4], 4294967040 }
 0x1f2   :  { %394 = vsyncpa [#allocation3], 1 }
 0x1f3   :  { %395 = vsyncpa [#allocation6], 1 }
 0x1f4   :  { %396 = vsyncpa [#allocation4], 1 }

</bundles_post_ra>
